<compile_context>
chip_gen: v6e
topology: v6e:2x2x1
jax: 0.10.0
libtpu: 0.0.40
codegen_flags: <defaults>
</compile_context>

<pallas_src>
import jax
import jax.numpy as jnp
from jax.experimental import pallas as pl
from jax.experimental.pallas import tpu as pltpu


def deepant_kernel(x_ref, w1_ref, b1_ref, w2_ref, b2_ref,
                   wd1_ref, bd1_ref, wd2_ref, bd2_ref, o_ref):
    # x_ref: (L, Cin, TB)  -- batch on the lane axis.
    x = x_ref[...]
    L, Cin, TB = x.shape
    C = b1_ref.shape[0]            # 16
    Lp2, Lp4 = L // 2, L // 4

    # conv1 (kernel_size=1): per-position channel mix == batched matmul over L.
    # w1_ref: (L, 16, Cin) (weight pre-broadcast on host, resident in VMEM).
    y = jnp.einsum("loc,lcb->lob", w1_ref[...], x,
                   preferred_element_type=jnp.float32)
    y = jnp.maximum(y + b1_ref[...], 0.0)            # bias (16,1) + ReLU

    # MaxPool1d(2) over L: L is the leading (slab) axis, so splitting it and
    # taking a max of two static slabs is a pure VPU max with no relayout.
    yr = y.reshape(Lp2, 2, C, TB)
    p1 = jnp.maximum(yr[:, 0], yr[:, 1])             # (L/2, 16, TB)

    # conv2 (kernel_size=1)
    z = jnp.einsum("loc,lcb->lob", w2_ref[...], p1,
                   preferred_element_type=jnp.float32)
    z = jnp.maximum(z + b2_ref[...], 0.0)

    zr = z.reshape(Lp4, 2, C, TB)
    p2 = jnp.maximum(zr[:, 0], zr[:, 1])             # (L/4, 16, TB)

    # Flatten (l, c) -> rows.  Merges leading dim with a sublane dim that is a
    # multiple of 8, so the (8,128) tiling is preserved.  wd1's columns were
    # pre-permuted on the host to match PyTorch's channel-major Flatten order.
    f = p2.reshape(Lp4 * C, TB)                      # (80, TB)

    # dense 1 + ReLU   (W on the left keeps batch in the lane axis)
    h = jnp.dot(wd1_ref[...], f, preferred_element_type=jnp.float32)
    h = jnp.maximum(h + bd1_ref[...], 0.0)           # (40, TB)

    # TODO(synk): train-mode Dropout(p=0.25) would need pltpu.prng_* masking;
    # eval/inference mode is the identity, which is what is implemented here.

    # dense 2 -> lane-dense output store (dim, TB)
    out = jnp.dot(wd2_ref[...], h, preferred_element_type=jnp.float32)
    o_ref[...] = (out + bd2_ref[...]).astype(o_ref.dtype)


def prepare_params(params, L=20):
    """One-time weight preparation (call once at load time, NOT per forward)."""
    C = params["conv1_b"].shape[0]                   # 16
    Cin = params["conv1_w"].shape[1]
    Lp2, Lp4 = L // 2, L // 4
    dim = params["fc2_w"].shape[0]

    w1 = params["conv1_w"][:, :, 0].astype(jnp.float32)       # (16, Cin)
    w2 = params["conv2_w"][:, :, 0].astype(jnp.float32)       # (16, 16)

    # Our flatten order is (l, c); PyTorch's is (c, l):  perm[l*C + c] = c*Lp4 + l
    perm = (jnp.arange(C)[None, :] * Lp4 + jnp.arange(Lp4)[:, None]).reshape(-1)

    return {
        "w1":  jnp.broadcast_to(w1[None], (L, C, Cin)),        # (L, 16, Cin)
        "b1":  params["conv1_b"].astype(jnp.float32)[:, None],  # (16, 1)
        "w2":  jnp.broadcast_to(w2[None], (Lp2, C, C)),         # (L/2, 16, 16)
        "b2":  params["conv2_b"].astype(jnp.float32)[:, None],  # (16, 1)
        "wd1": params["fc1_w"].astype(jnp.float32)[:, perm],    # (40, 80) permuted
        "bd1": params["fc1_b"].astype(jnp.float32)[:, None],    # (40, 1)
        "wd2": params["fc2_w"].astype(jnp.float32),             # (dim, 40)
        "bd2": params["fc2_b"].astype(jnp.float32)[:, None],    # (dim, 1)
    }


def deepant_forward_fb(x_lcb, prep, *, tb=512):
    """Steady-state entry point.

    x_lcb: (L, Cin, B) float32 -- feature-major, batch-last layout (batch on
           the lane axis).  Returns (dim, B).
    """
    assert tb % 128 == 0, "batch tile must be a multiple of 128 lanes"
    L, Cin, B = x_lcb.shape
    dim = prep["wd2"].shape[0]

    # Pad batch up to a multiple of the tile.
    n_blk = pl.cdiv(B, tb)
    Bp = n_blk * tb
    if Bp != B:
        x_lcb = jnp.pad(x_lcb, ((0, 0), (0, 0), (0, Bp - B)))

    const3 = lambda i: (0, 0, 0)
    const2 = lambda i: (0, 0)

    out = pl.pallas_call(
        deepant_kernel,
        out_shape=jax.ShapeDtypeStruct((dim, Bp), jnp.float32),
        grid=(n_blk,),
        in_specs=[
            pl.BlockSpec((L, Cin, tb), lambda i: (0, 0, i)),      # streamed x
            pl.BlockSpec(prep["w1"].shape, const3),               # resident weights
            pl.BlockSpec(prep["b1"].shape, const2),
            pl.BlockSpec(prep["w2"].shape, const3),
            pl.BlockSpec(prep["b2"].shape, const2),
            pl.BlockSpec(prep["wd1"].shape, const2),
            pl.BlockSpec(prep["bd1"].shape, const2),
            pl.BlockSpec(prep["wd2"].shape, const2),
            pl.BlockSpec(prep["bd2"].shape, const2),
        ],
        out_specs=pl.BlockSpec((dim, tb), lambda i: (0, i)),
        compiler_params=pltpu.CompilerParams(
            dimension_semantics=("parallel",),        # megacore on v7x
            vmem_limit_bytes=32 * 1024 * 1024,        # portable to v7x 64 MiB VMEM
        ),
    )(x_lcb, prep["w1"], prep["b1"], prep["w2"], prep["b2"],
      prep["wd1"], prep["bd1"], prep["wd2"], prep["bd2"])

    return out[:, :B]


def deepant_forward(x_ncl, prep, *, tb=512):
    """PyTorch-layout compat wrapper: x_ncl (B, Cin, L) -> (B, dim).

    Production callers should feed (L, Cin, B) directly via deepant_forward_fb
    to avoid this per-call transpose (an extra HBM pass).
    """
    x_lcb = jnp.transpose(x_ncl, (2, 1, 0))
    return deepant_forward_fb(x_lcb, prep, tb=tb).T


def deepant_reference(x_ncl, params):
    """Pure-JAX replica of the PyTorch forward (eval mode)."""
    B = x_ncl.shape[0]
    L = x_ncl.shape[2]
    y = jnp.einsum("oc,bcl->bol", params["conv1_w"][:, :, 0], x_ncl) \
        + params["conv1_b"][None, :, None]
    y = jax.nn.relu(y)
    y = y.reshape(B, 16, L // 2, 2).max(-1)
    y = jnp.einsum("oc,bcl->bol", params["conv2_w"][:, :, 0], y) \
        + params["conv2_b"][None, :, None]
    y = jax.nn.relu(y)
    y = y.reshape(B, 16, L // 4, 2).max(-1)
    f = y.reshape(B, 16 * (L // 4))               # channel-major flatten (PyTorch)
    h = jax.nn.relu(f @ params["fc1_w"].T + params["fc1_b"])
    return h @ params["fc2_w"].T + params["fc2_b"]


def init_params(key, lookback_size, dimension):
    ks = jax.random.split(key, 8)
    u = lambda k, shape, s: jax.random.uniform(k, shape, jnp.float32, -s, s)
    return {
        "conv1_w": u(ks[0], (16, lookback_size, 1), 0.5),
        "conv1_b": u(ks[1], (16,), 0.5),
        "conv2_w": u(ks[2], (16, 16, 1), 0.25),
        "conv2_b": u(ks[3], (16,), 0.25),
        "fc1_w":   u(ks[4], (40, 80), 0.11),
        "fc1_b":   u(ks[5], (40,), 0.11),
        "fc2_w":   u(ks[6], (dimension, 40), 0.16),
        "fc2_b":   u(ks[7], (dimension,), 0.16),
    }


if __name__ == "__main__":
    # Linear(80, 40) forces 16 * (L // 4) == 80  =>  L == 20.
    B, lookback_size, L, dimension = 256, 4, 20, 8
    TB = 128                                        # 2-step batch grid

    key = jax.random.PRNGKey(0)
    kx, kp = jax.random.split(key)

    # Steady-state layout: (L, Cin, B), batch on the lane axis.
    x_lcb = jax.random.normal(kx, (L, lookback_size, B), jnp.float32)
    params = init_params(kp, lookback_size, dimension)
    prep = prepare_params(params, L=L)              # one-time weight prep

    out_fb = deepant_forward_fb(x_lcb, prep, tb=TB)           # (dim, B)
    out_fb = jax.block_until_ready(out_fb)

    # Correctness vs a pure-JAX replica of the PyTorch forward (NCL layout;
    # this transpose is test-only plumbing).
    x_ncl = jnp.transpose(x_lcb, (2, 1, 0))
    ref = deepant_reference(x_ncl, params)

    assert out_fb.shape == (dimension, B)
    assert jnp.allclose(out_fb.T, ref, atol=1e-4, rtol=1e-4), "mismatch vs reference"

    print("KERNEL_OK")
</pallas_src>

<mosaic_0001>
module attributes {stable_mosaic.version = 11 : i64} {
  func.func @deepant_kernel(%arg0: i32, %arg1: memref<20x4x128xf32, #tpu.memory_space<vmem>>, %arg2: memref<20x16x4xf32, #tpu.memory_space<vmem>>, %arg3: memref<16x1xf32, #tpu.memory_space<vmem>>, %arg4: memref<10x16x16xf32, #tpu.memory_space<vmem>>, %arg5: memref<16x1xf32, #tpu.memory_space<vmem>>, %arg6: memref<40x80xf32, #tpu.memory_space<vmem>>, %arg7: memref<40x1xf32, #tpu.memory_space<vmem>>, %arg8: memref<8x40xf32, #tpu.memory_space<vmem>>, %arg9: memref<8x1xf32, #tpu.memory_space<vmem>>, %arg10: memref<8x128xf32, #tpu.memory_space<vmem>>) attributes {dimension_semantics = [#tpu.dimension_semantics<parallel>], iteration_bounds = array<i64: 2>, scalar_prefetch = 0 : i64, scratch_operands = 0 : i64, tpu.core_type = #tpu.core_type<tc>, window_params = [{transform_indices = @transform_0, window_bounds = array<i64: 20, 4, 128>}, {pipeline_mode = #tpu.pipeline_mode<synchronous>, transform_indices = @transform_1, window_bounds = array<i64: 20, 16, 4>}, {pipeline_mode = #tpu.pipeline_mode<synchronous>, transform_indices = @transform_2, window_bounds = array<i64: 16, 1>}, {pipeline_mode = #tpu.pipeline_mode<synchronous>, transform_indices = @transform_3, window_bounds = array<i64: 10, 16, 16>}, {pipeline_mode = #tpu.pipeline_mode<synchronous>, transform_indices = @transform_4, window_bounds = array<i64: 16, 1>}, {pipeline_mode = #tpu.pipeline_mode<synchronous>, transform_indices = @transform_5, window_bounds = array<i64: 40, 80>}, {pipeline_mode = #tpu.pipeline_mode<synchronous>, transform_indices = @transform_6, window_bounds = array<i64: 40, 1>}, {pipeline_mode = #tpu.pipeline_mode<synchronous>, transform_indices = @transform_7, window_bounds = array<i64: 8, 40>}, {pipeline_mode = #tpu.pipeline_mode<synchronous>, transform_indices = @transform_8, window_bounds = array<i64: 8, 1>}, {transform_indices = @transform_9, window_bounds = array<i64: 8, 128>}]} {
    %c0 = arith.constant 0 : index
    %c0_0 = arith.constant 0 : index
    %c0_1 = arith.constant 0 : index
    %0 = vector.load %arg1[%c0, %c0_0, %c0_1] : memref<20x4x128xf32, #tpu.memory_space<vmem>>, vector<20x4x128xf32>
    %c0_2 = arith.constant 0 : index
    %c0_3 = arith.constant 0 : index
    %c0_4 = arith.constant 0 : index
    %1 = vector.load %arg2[%c0_2, %c0_3, %c0_4] : memref<20x16x4xf32, #tpu.memory_space<vmem>>, vector<20x16x4xf32>
    "tpu.trace_start"() <{level = 10 : i32, message = "loc,lcb->lob"}> : () -> ()
    %cst = arith.constant dense<0.000000e+00> : vector<20x16x128xf32>
    %2 = tpu.matmul %1, %0, %cst {dimension_numbers = #tpu.dot_dimension_numbers<[2], [1], [1], [2], [0, 0, 0, 1, 1, 2], [0], [0]>} : vector<20x16x4xf32>, vector<20x4x128xf32>, vector<20x16x128xf32> -> vector<20x16x128xf32>
    "tpu.trace_stop"() : () -> ()
    %c0_5 = arith.constant 0 : index
    %c0_6 = arith.constant 0 : index
    %3 = vector.load %arg3[%c0_5, %c0_6] : memref<16x1xf32, #tpu.memory_space<vmem>>, vector<16x1xf32>
    %4 = vector.shape_cast %3 : vector<16x1xf32> to vector<1x16x1xf32>
    %5 = vector.broadcast %4 : vector<1x16x1xf32> to vector<20x16x128xf32>
    %6 = arith.addf %2, %5 : vector<20x16x128xf32>
    %cst_7 = arith.constant 0.000000e+00 : f32
    %7 = vector.broadcast %cst_7 : f32 to vector<20x16x128xf32>
    %8 = arith.maximumf %6, %7 : vector<20x16x128xf32>
    %9 = vector.shape_cast %8 : vector<20x16x128xf32> to vector<10x2x16x128xf32>
    %10 = vector.extract_strided_slice %9 {offsets = [0, 0, 0, 0], sizes = [10, 1, 16, 128], strides = [1, 1, 1, 1]} : vector<10x2x16x128xf32> to vector<10x1x16x128xf32>
    %11 = vector.shape_cast %10 : vector<10x1x16x128xf32> to vector<10x16x128xf32>
    %12 = vector.extract_strided_slice %9 {offsets = [0, 1, 0, 0], sizes = [10, 1, 16, 128], strides = [1, 1, 1, 1]} : vector<10x2x16x128xf32> to vector<10x1x16x128xf32>
    %13 = vector.shape_cast %12 : vector<10x1x16x128xf32> to vector<10x16x128xf32>
    %14 = arith.maximumf %11, %13 : vector<10x16x128xf32>
    %c0_8 = arith.constant 0 : index
    %c0_9 = arith.constant 0 : index
    %c0_10 = arith.constant 0 : index
    %15 = vector.load %arg4[%c0_8, %c0_9, %c0_10] : memref<10x16x16xf32, #tpu.memory_space<vmem>>, vector<10x16x16xf32>
    "tpu.trace_start"() <{level = 10 : i32, message = "loc,lcb->lob"}> : () -> ()
    %cst_11 = arith.constant dense<0.000000e+00> : vector<10x16x128xf32>
    %16 = tpu.matmul %15, %14, %cst_11 {dimension_numbers = #tpu.dot_dimension_numbers<[2], [1], [1], [2], [0, 0, 0, 1, 1, 2], [0], [0]>} : vector<10x16x16xf32>, vector<10x16x128xf32>, vector<10x16x128xf32> -> vector<10x16x128xf32>
    "tpu.trace_stop"() : () -> ()
    %c0_12 = arith.constant 0 : index
    %c0_13 = arith.constant 0 : index
    %17 = vector.load %arg5[%c0_12, %c0_13] : memref<16x1xf32, #tpu.memory_space<vmem>>, vector<16x1xf32>
    %18 = vector.shape_cast %17 : vector<16x1xf32> to vector<1x16x1xf32>
    %19 = vector.broadcast %18 : vector<1x16x1xf32> to vector<10x16x128xf32>
    %20 = arith.addf %16, %19 : vector<10x16x128xf32>
    %cst_14 = arith.constant 0.000000e+00 : f32
    %21 = vector.broadcast %cst_14 : f32 to vector<10x16x128xf32>
    %22 = arith.maximumf %20, %21 : vector<10x16x128xf32>
    %23 = vector.shape_cast %22 : vector<10x16x128xf32> to vector<5x2x16x128xf32>
    %24 = vector.extract_strided_slice %23 {offsets = [0, 0, 0, 0], sizes = [5, 1, 16, 128], strides = [1, 1, 1, 1]} : vector<5x2x16x128xf32> to vector<5x1x16x128xf32>
    %25 = vector.shape_cast %24 : vector<5x1x16x128xf32> to vector<5x16x128xf32>
    %26 = vector.extract_strided_slice %23 {offsets = [0, 1, 0, 0], sizes = [5, 1, 16, 128], strides = [1, 1, 1, 1]} : vector<5x2x16x128xf32> to vector<5x1x16x128xf32>
    %27 = vector.shape_cast %26 : vector<5x1x16x128xf32> to vector<5x16x128xf32>
    %28 = arith.maximumf %25, %27 : vector<5x16x128xf32>
    %29 = vector.shape_cast %28 : vector<5x16x128xf32> to vector<80x128xf32>
    %c0_15 = arith.constant 0 : index
    %c0_16 = arith.constant 0 : index
    %30 = vector.load %arg6[%c0_15, %c0_16] : memref<40x80xf32, #tpu.memory_space<vmem>>, vector<40x80xf32>
    %cst_17 = arith.constant dense<0.000000e+00> : vector<40x128xf32>
    %31 = tpu.matmul %30, %29, %cst_17 {dimension_numbers = #tpu.dot_dimension_numbers<[1], [0], [0], [1], [0, 0, 1, 1], [], []>} : vector<40x80xf32>, vector<80x128xf32>, vector<40x128xf32> -> vector<40x128xf32>
    %c0_18 = arith.constant 0 : index
    %c0_19 = arith.constant 0 : index
    %32 = vector.load %arg7[%c0_18, %c0_19] : memref<40x1xf32, #tpu.memory_space<vmem>>, vector<40x1xf32>
    %33 = vector.broadcast %32 : vector<40x1xf32> to vector<40x128xf32>
    %34 = arith.addf %31, %33 : vector<40x128xf32>
    %cst_20 = arith.constant 0.000000e+00 : f32
    %35 = vector.broadcast %cst_20 : f32 to vector<40x128xf32>
    %36 = arith.maximumf %34, %35 : vector<40x128xf32>
    %c0_21 = arith.constant 0 : index
    %c0_22 = arith.constant 0 : index
    %37 = vector.load %arg8[%c0_21, %c0_22] : memref<8x40xf32, #tpu.memory_space<vmem>>, vector<8x40xf32>
    %cst_23 = arith.constant dense<0.000000e+00> : vector<8x128xf32>
    %38 = tpu.matmul %37, %36, %cst_23 {dimension_numbers = #tpu.dot_dimension_numbers<[1], [0], [0], [1], [0, 0, 1, 1], [], []>} : vector<8x40xf32>, vector<40x128xf32>, vector<8x128xf32> -> vector<8x128xf32>
    %c0_24 = arith.constant 0 : index
    %c0_25 = arith.constant 0 : index
    %39 = vector.load %arg9[%c0_24, %c0_25] : memref<8x1xf32, #tpu.memory_space<vmem>>, vector<8x1xf32>
    %40 = vector.broadcast %39 : vector<8x1xf32> to vector<8x128xf32>
    %41 = arith.addf %38, %40 : vector<8x128xf32>
    %c0_26 = arith.constant 0 : index
    %c0_27 = arith.constant 0 : index
    %42 = vector.load %arg10[%c0_26, %c0_27] : memref<8x128xf32, #tpu.memory_space<vmem>>, vector<8x128xf32>
    tpu.vector_store %arg10[%c0_26, %c0_27], %41 {strides = array<i32>} : memref<8x128xf32, #tpu.memory_space<vmem>>, vector<8x128xf32>,
    return
  }
  func.func @transform_0(%arg0: i32) -> (i32, i32, i32) {
    %c0_i32 = arith.constant 0 : i32
    %c0_i32_0 = arith.constant 0 : i32
    %c0_i32_1 = arith.constant 0 : i32
    return %c0_i32, %c0_i32_0, %arg0 : i32, i32, i32
  }
  func.func @transform_1(%arg0: i32) -> (i32, i32, i32) {
    %c0_i32 = arith.constant 0 : i32
    %c0_i32_0 = arith.constant 0 : i32
    %c0_i32_1 = arith.constant 0 : i32
    %c0_i32_2 = arith.constant 0 : i32
    return %c0_i32, %c0_i32_0, %c0_i32_1 : i32, i32, i32
  }
  func.func @transform_2(%arg0: i32) -> (i32, i32) {
    %c0_i32 = arith.constant 0 : i32
    %c0_i32_0 = arith.constant 0 : i32
    %c0_i32_1 = arith.constant 0 : i32
    return %c0_i32, %c0_i32_0 : i32, i32
  }
  func.func @transform_3(%arg0: i32) -> (i32, i32, i32) {
    %c0_i32 = arith.constant 0 : i32
    %c0_i32_0 = arith.constant 0 : i32
    %c0_i32_1 = arith.constant 0 : i32
    %c0_i32_2 = arith.constant 0 : i32
    return %c0_i32, %c0_i32_0, %c0_i32_1 : i32, i32, i32
  }
  func.func @transform_4(%arg0: i32) -> (i32, i32) {
    %c0_i32 = arith.constant 0 : i32
    %c0_i32_0 = arith.constant 0 : i32
    %c0_i32_1 = arith.constant 0 : i32
    return %c0_i32, %c0_i32_0 : i32, i32
  }
  func.func @transform_5(%arg0: i32) -> (i32, i32) {
    %c0_i32 = arith.constant 0 : i32
    %c0_i32_0 = arith.constant 0 : i32
    %c0_i32_1 = arith.constant 0 : i32
    return %c0_i32, %c0_i32_0 : i32, i32
  }
  func.func @transform_6(%arg0: i32) -> (i32, i32) {
    %c0_i32 = arith.constant 0 : i32
    %c0_i32_0 = arith.constant 0 : i32
    %c0_i32_1 = arith.constant 0 : i32
    return %c0_i32, %c0_i32_0 : i32, i32
  }
  func.func @transform_7(%arg0: i32) -> (i32, i32) {
    %c0_i32 = arith.constant 0 : i32
    %c0_i32_0 = arith.constant 0 : i32
    %c0_i32_1 = arith.constant 0 : i32
    return %c0_i32, %c0_i32_0 : i32, i32
  }
  func.func @transform_8(%arg0: i32) -> (i32, i32) {
    %c0_i32 = arith.constant 0 : i32
    %c0_i32_0 = arith.constant 0 : i32
    %c0_i32_1 = arith.constant 0 : i32
    return %c0_i32, %c0_i32_0 : i32, i32
  }
  func.func @transform_9(%arg0: i32) -> (i32, i32) {
    %c0_i32 = arith.constant 0 : i32
    %c0_i32_0 = arith.constant 0 : i32
    return %c0_i32, %arg0 : i32, i32
  }
}

</mosaic_0001>

<bundles_post_ra>
// kernel: tpu_custom_call.1
= control target key start
LH: loop header
LB: loop body
LE: loop exit
PB: predicated region body
PF: predicated region fallthrough
CT: control target
= control target key end

     0   :  { %14 = vsyncpa [#allocation4], 0  ;;  %s4630_s0 = inlined_call_operand.vmem [shape: f32[20,4,256], index: 0, kind: input, shape index: {}]   ;;  %s4631_s1 = inlined_call_operand.vmem [shape: f32[20,16,4], index: 1, kind: input, shape index: {}]   ;;  %s4632_s2 = inlined_call_operand.vmem [shape: f32[16,1], index: 2, kind: input, shape index: {}]   ;;  %s4633_s3 = inlined_call_operand.vmem [shape: f32[10,16,16], index: 3, kind: input, shape index: {}]   ;;  %s4634_s4 = inlined_call_operand.vmem [shape: f32[16,1], index: 4, kind: input, shape index: {}]   ;;  %s4635_s5 = inlined_call_operand.vmem [shape: f32[40,80], index: 5, kind: input, shape index: {}]   ;;  %s4636_s6 = inlined_call_operand.vmem [shape: f32[40,1], index: 6, kind: input, shape index: {}]   ;;  %s4637_s7 = inlined_call_operand.vmem [shape: f32[8,40], index: 7, kind: input, shape index: {}]   ;;  %s4638_s8 = inlined_call_operand.vmem [shape: f32[8,1], index: 8, kind: input, shape index: {}]   ;;  %s4639_s9 = inlined_call_operand.hbm [shape: f32[8,256], index: 9, kind: output, shape index: {}]  }
   0x1   :  { %16 = vsyncpa [#allocation4 + $0x1], 0  ;;  %s4041_s30 = smov 0   ;;  %s4043_s10 = smov 0  }
   0x2   :  { %s4045_s11 = smov 0   ;;  %s4047_s12 = smov 0  }
   0x3 LB: > { %s3443_s13 = sadd.s32 4294967295, %s3985_s12   ;;  %s3444_s14 = sadd.s32 4294967294, %s3985_s12   ;;  %s3985_s12 = sphi %s4047_s12, %s4645_s12   ;;  %s3981_s11 = sphi %s4045_s11, %s4644_s11   ;;  %s3977_s10 = sphi %s4043_s10, %s4643_s10   ;;  %s3973_s30 = sphi %s4041_s30, %s4642_s30  }
   0x4   : > { %s4064_s15 = sadd.s32 1, %s3985_s12   ;;  %s29_s16 = sadd.s32 1, %s3981_s11 }
   0x5   : > { %s26_s17 = ssub.s32 %s3985_s12, %s4064_s15  ;;  %p36_p0 = scmp.ne.s32.totalorder %s3981_s11, %s3977_s10 }
   0x6   : > { %p27_p1 = scmp.eq.s32.totalorder %s26_s17, 0  ;;  %p37_p2 = scmp.eq.s32.totalorder %s3985_s12, 0 }
   0x7   : > { %p234_p3 = scmp.eq.s32.totalorder %s3443_s13, 1  ;;  %p239_p4 = scmp.ne.s32.totalorder %s3977_s10, %s3973_s30 }
   0x8   : > { %s4077_s18 = scalar_select %p27_p1, %s3981_s11, %s29_s16  }
   0x9   : > { %p38_p5 = por %p37_p2, %p36_p0  ;;  %p4079_p6 = por %p234_p3, %p36_p0 }
   0xa   : > { %p240_p7 = scmp.eq.s32.totalorder %s3444_s14, 1  ;;  %p3446_p9 = scmp.ge.s32.totalorder %s3985_s12, 2 }
   0xc   : > { %p4083_p8 = por %p240_p7, %p239_p4  ;;  %280 = sbr.rel (%p3446_p9) target bundleno = 34 (0x22), region = 48 }
  0x11   : > { %283 = sbr.rel (!%p38_p5) target bundleno = 34 (0x22), region = 52  ;;  %s285_s21 = sand.u32 (%p38_p5), 1, %s3981_s11  }
  0x12   : > { %s3447_s22 = sshll.u32 (%p38_p5), %s3985_s12, 2  ;;  %s3879_s23 = smul.u32 (%p38_p5), 80, %s285_s21 }
  0x13   : > { %s4095_s26 = scalar_lea.vmem (%p38_p5), %s4630_s0, %s3447_s22 }
  0x14   : > { %v306_v0 = vld [vmem:[%s4095_s26] sm:$0xf] (%p38_p5)  ;;  %v308_v1 = vld [vmem:[%s4095_s26 + $0x8] sm:$0xf] (%p38_p5)  ;;  %v310_v2 = vld [vmem:[%s4095_s26 + $0x10] sm:$0xf] (%p38_p5) }
  0x15   : > { %v312_v3 = vld [vmem:[%s4095_s26 + $0x18] sm:$0xf] (%p38_p5)  ;;  %v314_v4 = vld [vmem:[%s4095_s26 + $0x20] sm:$0xf] (%p38_p5)  ;;  %s4102_s27 = scalar_lea.vmem (%p38_p5), [#allocation2], %s3879_s23 }
  0x16   : > { %307 = vst [vmem:[%s4102_s27] sm:$0xf] %v306_v0  ;;  %309 = vst [vmem:[%s4102_s27 + $0x4] sm:$0xf] %v308_v1  ;;  %v316_v5 = vld [vmem:[%s4095_s26 + $0x28] sm:$0xf] }
  0x17   : > { %311 = vst [vmem:[%s4102_s27 + $0x8] sm:$0xf] %v310_v2  ;;  %313 = vst [vmem:[%s4102_s27 + $0xc] sm:$0xf] %v312_v3  ;;  %v318_v6 = vld [vmem:[%s4095_s26 + $0x30] sm:$0xf] }
  0x18   : > { %315 = vst [vmem:[%s4102_s27 + $0x10] sm:$0xf] %v314_v4  ;;  %v320_v7 = vld [vmem:[%s4095_s26 + $0x38] sm:$0xf]  ;;  %317 = vst [vmem:[%s4102_s27 + $0x14] sm:$0xf] %v316_v5 }
  0x19   : > { %319 = vst [vmem:[%s4102_s27 + $0x18] sm:$0xf] %v318_v6  ;;  %321 = vst [vmem:[%s4102_s27 + $0x1c] sm:$0xf] %v320_v7  ;;  %v322_v8 = vld [vmem:[%s4095_s26 + $0x40] sm:$0xf] }
  0x1a   : > { %v324_v9 = vld [vmem:[%s4095_s26 + $0x48] sm:$0xf]  ;;  %v326_v10 = vld [vmem:[%s4095_s26 + $0x50] sm:$0xf]  ;;  %323 = vst [vmem:[%s4102_s27 + $0x20] sm:$0xf] %v322_v8 }
  0x1b   : > { %325 = vst [vmem:[%s4102_s27 + $0x24] sm:$0xf] %v324_v9  ;;  %327 = vst [vmem:[%s4102_s27 + $0x28] sm:$0xf] %v326_v10  ;;  %v328_v11 = vld [vmem:[%s4095_s26 + $0x58] sm:$0xf] }
  0x1c   : > { %v330_v12 = vld [vmem:[%s4095_s26 + $0x60] sm:$0xf]  ;;  %v332_v13 = vld [vmem:[%s4095_s26 + $0x68] sm:$0xf]  ;;  %329 = vst [vmem:[%s4102_s27 + $0x2c] sm:$0xf] %v328_v11 }
  0x1d   : > { %331 = vst [vmem:[%s4102_s27 + $0x30] sm:$0xf] %v330_v12  ;;  %333 = vst [vmem:[%s4102_s27 + $0x34] sm:$0xf] %v332_v13  ;;  %v334_v14 = vld [vmem:[%s4095_s26 + $0x70] sm:$0xf] }
  0x1e   : > { %v336_v15 = vld [vmem:[%s4095_s26 + $0x78] sm:$0xf]  ;;  %v338_v16 = vld [vmem:[%s4095_s26 + $0x80] sm:$0xf]  ;;  %335 = vst [vmem:[%s4102_s27 + $0x38] sm:$0xf] %v334_v14 }
  0x1f   : > { %337 = vst [vmem:[%s4102_s27 + $0x3c] sm:$0xf] %v336_v15  ;;  %339 = vst [vmem:[%s4102_s27 + $0x40] sm:$0xf] %v338_v16  ;;  %v340_v17 = vld [vmem:[%s4095_s26 + $0x88] sm:$0xf] }
  0x20   : > { %v342_v18 = vld [vmem:[%s4095_s26 + $0x90] sm:$0xf]  ;;  %v344_v19 = vld [vmem:[%s4095_s26 + $0x98] sm:$0xf]  ;;  %341 = vst [vmem:[%s4102_s27 + $0x44] sm:$0xf] %v340_v17 }
  0x21   : > { %343 = vst [vmem:[%s4102_s27 + $0x48] sm:$0xf] %v342_v18  ;;  %345 = vst [vmem:[%s4102_s27 + $0x4c] sm:$0xf] %v344_v19 }
  0x22 PF: > { %p3448_p10 = scmp.ge.s32.totalorder %s3985_s12, 1  ;;  %p408_p11 = scmp.lt.s32.totalorder %s3985_s12, 3 }
  0x24   : > { %p409_p12 = pnand %p3448_p10, %p408_p11 }
  0x25   : > { %s4142_s28 = sand.u32 (!%p409_p12), 1, %s3977_s10   ;;  %s3537_s26 = sshll.u32 (!%p409_p12), %s3443_s13, 7 }
  0x26   : > { %412 = sbr.rel (%p409_p12) target bundleno = 947 (0x3b3), region = 93  ;;  %s3449_s25 = sshll.u32 (!%p409_p12), %s4142_s28, 3 }
  0x27   : > { %s3880_s16 = smul.u32 (!%p409_p12), 80, %s4142_s28  ;;  %s3366_s17 = scalar_lea.sflag (!%p409_p12), [#allocation4], %s4142_s28 }
  0x28   : > { %s3990_s13 = smov (!%p409_p12), [#allocation3]  }
  0x29   : > { %s4156_s24 = scalar_lea.vmem (!%p409_p12), [#allocation2], %s3880_s16  ;;  %s4593_s16 = scalar_lea.hbm (!%p409_p12), %s4639_s9, %s3537_s26 }
  0x2a   : > { %s3929_s22 = sshll.u32 (!%p409_p12), %s3990_s13, 4  ;;  %s3930_s22 = int_to_ptr.vmem [resolvable:$false] %s3929_s22 }
  0x2b   : > { %v470_v20 = vld [vmem:[%s4631_s1] sm:$0xff]  ;;  %vm522_vm0 = vcmask 31744   ;;  %vm529_vm1 = vcmask 1043456   ;;  %v3987_v22 = vmov 0   ;;  %v471_v23 = vld [vmem:[%s4631_s1 + $0x8] sm:$0xff]  ;;  %v472_v27 = vld [vmem:[%s4631_s1 + $0x10] sm:$0xff] }
  0x2c   : > { %3663 = vmatprep.mubr.msk.f32.mxu1 %vm522_vm0, %v470_v20  ;;  %v482_v21 = vld [vmem:[%s4631_s1 + $0x60] sm:$0xff]  ;;  %3923 = vset.pattern.permute.xlu0 %v3987_v22  ;;  %v456_v26 = vld [vmem:[%s4156_s24 + $0x18] sm:$0xf]  ;;  %v452_v28 = vld [vmem:[%s4156_s24 + $0x8] sm:$0xf]  ;;  %vm2296_vm2 = vcmask 130048  }
  0x2d   : > { %3693 = vmatprep.mubr.msk.f32.mxu0 %vm522_vm0, %v482_v21  ;;  %3924 = vset.pattern.permute.xlu1 %v3987_v22  ;;  %v450_v24 = vld [vmem:[%s4156_s24] sm:$0xf]  ;;  %v451_v25 = vld [vmem:[%s4156_s24 + $0x4] sm:$0xf]  ;;  %v483_v29 = vld [vmem:[%s4631_s1 + $0x68] sm:$0xff]  ;;  %vm3989_vm3 = vmmov 0  }
  0x2e   : > { %3661 = vmatprep.subr.msk.mxu1 %vm529_vm1, %v450_v24  ;;  %3691 = vmatprep.subr.msk.mxu0 %vm529_vm1, %v456_v26  ;;  %v458_v30 = vld [vmem:[%s4156_s24 + $0x20] sm:$0xf]  ;;  %v473_v32 = vld [vmem:[%s4631_s1 + $0x18] sm:$0xff]  ;;  %v487_v35 = vld [vmem:[%s4631_s1 + $0x88] sm:$0xff]  ;;  %vm3172_vm4 = vcmask 654336   ;;  %vm3290_vm5 = vcmask 326656  }
  0x2f   : > { %3662 = vmatpush3.msk.msra.mxu1 %vm529_vm1, %v450_v24  ;;  %3692 = vmatpush3.msk.msra.mxu0 %vm529_vm1, %v456_v26  ;;  %v486_v31 = vld [vmem:[%s4631_s1 + $0x80] sm:$0xff]  ;;  %v453_v34 = vld [vmem:[%s4156_s24 + $0xc] sm:$0xf]  ;;  %v460_v36 = vld [vmem:[%s4156_s24 + $0x28] sm:$0xf]  ;;  %s3931_s23 = scalar_lea.vmem %s3930_s22, 256 }
  0x30   : > { %3664 = vmatmul.mubr.msk.f32.vlgmr.msra.gmra.mxu1 %vm522_vm0, %v471_v23  ;;  %3666 = vmatprep.subr.msk.mxu1 %vm529_vm1, %v451_v25  ;;  %v474_v33 = vld [vmem:[%s4631_s1 + $0x20] sm:$0xff]  ;;  %v475_v38 = vld [vmem:[%s4631_s1 + $0x28] sm:$0xff]  ;;  %v476_v39 = vld [vmem:[%s4631_s1 + $0x30] sm:$0xff] }
  0x31   : > { %3667 = vmatpush3.msk.msra.mxu1 %vm529_vm1, %v451_v25  ;;  %3668 = vmatprep.mubr.msk.f32.mxu1 %vm522_vm0, %v472_v27  ;;  %v490_v37 = vld [vmem:[%s4631_s1 + $0xa0] sm:$0xff]  ;;  %v491_v41 = vld [vmem:[%s4631_s1 + $0xa8] sm:$0xff]  ;;  %v477_v44 = vld [vmem:[%s4631_s1 + $0x38] sm:$0xff] }
  0x32   : > { %3671 = vmatprep.subr.msk.mxu1 %vm529_vm1, %v452_v28  ;;  %3694 = vmatmul.mubr.msk.f32.vlgmr.msra.gmra.mxu0 %vm522_vm0, %v483_v29  ;;  %v454_v40 = vld [vmem:[%s4156_s24 + $0x10] sm:$0xf]  ;;  %v455_v46 = vld [vmem:[%s4156_s24 + $0x14] sm:$0xf]  ;;  %v495_v47 = vld [vmem:[%s4631_s1 + $0xc8] sm:$0xff] }
  0x33   : > { %3701 = vmatprep.subr.msk.mxu0 %vm529_vm1, %v458_v30  ;;  %3703 = vmatprep.mubr.msk.f32.mxu0 %vm522_vm0, %v486_v31  ;;  %v462_v42 = vld [vmem:[%s4156_s24 + $0x30] sm:$0xf]  ;;  %v464_v48 = vld [vmem:[%s4156_s24 + $0x38] sm:$0xf]  ;;  %v457_v52 = vld [vmem:[%s4156_s24 + $0x1c] sm:$0xf] }
  0x34   : > { %3669 = vmatmul.mubr.msk.f32.vlgmr.msra.gmra.mxu1 %vm522_vm0, %v473_v32  ;;  %3702 = vmatpush3.msk.msra.mxu0 %vm529_vm1, %v458_v30  ;;  %v494_v43 = vld [vmem:[%s4631_s1 + $0xc0] sm:$0xff]  ;;  %v479_v50 = vld [vmem:[%s4631_s1 + $0x48] sm:$0xff]  ;;  %v480_v51 = vld [vmem:[%s4631_s1 + $0x50] sm:$0xff] }
  0x35   : > { %3672 = vmatpush3.msk.msra.mxu1 %vm529_vm1, %v452_v28  ;;  %3673 = vmatprep.mubr.msk.f32.mxu1 %vm522_vm0, %v474_v33  ;;  %v478_v45 = vld [vmem:[%s4631_s1 + $0x40] sm:$0xff]  ;;  %v499_v53 = vld [vmem:[%s4631_s1 + $0xe8] sm:$0xff]  ;;  %v481_v56 = vld [vmem:[%s4631_s1 + $0x58] sm:$0xff] }
  0x36   : > { %3676 = vmatprep.subr.msk.mxu1 %vm529_vm1, %v453_v34  ;;  %3704 = vmatmul.mubr.msk.f32.vlgmr.msra.gmra.mxu0 %vm522_vm0, %v487_v35  ;;  %v498_v49 = vld [vmem:[%s4631_s1 + $0xe0] sm:$0xff]  ;;  %v484_v57 = vld [vmem:[%s4631_s1 + $0x70] sm:$0xff]  ;;  %v503_v59 = vld [vmem:[%s4631_s1 + $0x108] sm:$0xff] }
  0x37   : > { %3711 = vmatprep.subr.msk.mxu0 %vm529_vm1, %v460_v36  ;;  %3713 = vmatprep.mubr.msk.f32.mxu0 %vm522_vm0, %v490_v37  ;;  %v466_v54 = vld [vmem:[%s4156_s24 + $0x40] sm:$0xf]  ;;  %v459_v58 = vld [vmem:[%s4156_s24 + $0x24] sm:$0xf]  ;;  %v468_v60 = vld [vmem:[%s4156_s24 + $0x48] sm:$0xf] }
  0x38   : > { %3674 = vmatmul.mubr.msk.f32.vlgmr.msra.gmra.mxu1 %vm522_vm0, %v475_v38  ;;  %3712 = vmatpush3.msk.msra.mxu0 %vm529_vm1, %v460_v36  ;;  %v502_v55 = vld [vmem:[%s4631_s1 + $0x100] sm:$0xff]  ;;  %v485_v62 = vld [vmem:[%s4631_s1 + $0x78] sm:$0xff]  ;;  %v488_v63 = vld [vmem:[%s4631_s1 + $0x90] sm:$0xff] }
  0x39   : > { %3677 = vmatpush3.msk.msra.mxu1 %vm529_vm1, %v453_v34  ;;  %3678 = vmatprep.mubr.msk.f32.mxu1 %vm522_vm0, %v476_v39  ;;  %v506_v61 = vld [vmem:[%s4631_s1 + $0x120] sm:$0xff]  ;;  %v461_v0 = vld [vmem:[%s4156_s24 + $0x2c] sm:$0xf]  ;;  %v492_v4 = vld [vmem:[%s4631_s1 + $0xb0] sm:$0xff] }
  0x3a   : > { %3681 = vmatprep.subr.msk.mxu1 %vm529_vm1, %v454_v40  ;;  %3714 = vmatmul.mubr.msk.f32.vlgmr.msra.gmra.mxu0 %vm522_vm0, %v491_v41  ;;  %v507_v1 = vld [vmem:[%s4631_s1 + $0x128] sm:$0xff]  ;;  %v489_v3 = vld [vmem:[%s4631_s1 + $0x98] sm:$0xff]  ;;  %v463_v5 = vld [vmem:[%s4156_s24 + $0x34] sm:$0xf] }
  0x3b   : > { %3721 = vmatprep.subr.msk.mxu0 %vm529_vm1, %v462_v42  ;;  %3723 = vmatprep.mubr.msk.f32.mxu0 %vm522_vm0, %v494_v43  ;;  %v511_v2 = vld [vmem:[%s4632_s2 + $0x8] sm:$0xff]  ;;  %v510_v6 = vld [vmem:[%s4632_s2] sm:$0xff]  ;;  %v493_v7 = vld [vmem:[%s4631_s1 + $0xb8] sm:$0xff] }
  0x3c   : > { %3679 = vmatmul.mubr.msk.f32.vlgmr.msra.gmra.mxu1 %vm522_vm0, %v477_v44  ;;  %3722 = vmatpush3.msk.msra.mxu0 %vm529_vm1, %v462_v42  ;;  %v496_v8 = vld [vmem:[%s4631_s1 + $0xd0] sm:$0xff]  ;;  %v465_v9 = vld [vmem:[%s4156_s24 + $0x3c] sm:$0xf]  ;;  %v3146_v10 = vld [vmem:[%s4636_s6 + $0x20] sm:$0xff] }
  0x3d   : > { %3682 = vmatpush3.msk.msra.mxu1 %vm529_vm1, %v454_v40  ;;  %3683 = vmatprep.mubr.msk.f32.mxu1 %vm522_vm0, %v478_v45  ;;  %v497_v11 = vld [vmem:[%s4631_s1 + $0xd8] sm:$0xff]  ;;  %v500_v12 = vld [vmem:[%s4631_s1 + $0xf0] sm:$0xff]  ;;  %v3142_v18 = vld [vmem:[%s4636_s6] sm:$0xff] }
  0x3e   : > { %3686 = vmatprep.subr.msk.mxu1 %vm529_vm1, %v455_v46  ;;  %3724 = vmatmul.mubr.msk.f32.vlgmr.msra.gmra.mxu0 %vm522_vm0, %v495_v47  ;;  %v467_v13 = vld [vmem:[%s4156_s24 + $0x44] sm:$0xf]  ;;  %v501_v15 = vld [vmem:[%s4631_s1 + $0xf8] sm:$0xff]  ;;  %v2285_v24 = vld [vmem:[%s4634_s4 + $0x8] sm:$0xff] }
  0x3f   : > { %3731 = vmatprep.subr.msk.mxu0 %vm529_vm1, %v464_v48  ;;  %3733 = vmatprep.mubr.msk.f32.mxu0 %vm522_vm0, %v498_v49  ;;  %v3144_v14 = vld [vmem:[%s4636_s6 + $0x10] sm:$0xff]  ;;  %v469_v17 = vld [vmem:[%s4156_s24 + $0x4c] sm:$0xf]  ;;  %v2264_v22 = vld [vmem:[%s4633_s3] sm:$0xff]  ;;  %s449_s24 = scalar_lea.vmem [#allocation3], %s3449_s25 }
  0x40   : > { %3684 = vmatmul.mubr.msk.f32.vlgmr.msra.gmra.mxu1 %vm522_vm0, %v479_v50  ;;  %3732 = vmatpush3.msk.msra.mxu0 %vm529_vm1, %v464_v48  ;;  %v504_v16 = vld [vmem:[%s4631_s1 + $0x110] sm:$0xff]  ;;  %v505_v19 = vld [vmem:[%s4631_s1 + $0x118] sm:$0xff]  ;;  %v2284_v25 = vld [vmem:[%s4634_s4] sm:$0xff]  ;;  %s3379_s27 = sshll.u32 %s449_s24, 4  ;;  %s3380_s27 = int_to_ptr.vmem [resolvable:$true] %s3379_s27 }
  0x41   : > { %3687 = vmatpush3.msk.msra.mxu1 %vm529_vm1, %v455_v46  ;;  %3688 = vmatprep.mubr.msk.f32.mxu1 %vm522_vm0, %v480_v51  ;;  %v508_v20 = vld [vmem:[%s4631_s1 + $0x130] sm:$0xff]  ;;  %v509_v21 = vld [vmem:[%s4631_s1 + $0x138] sm:$0xff]  ;;  %v3143_v27 = vld [vmem:[%s4636_s6 + $0x8] sm:$0xff]  ;;  %s3925_s21 = scalar_lea.vmem %s3380_s27, 128  ;;  %p3932_p2 = scmp.lt.s32.totalorder %s3380_s27, %s3930_s22 }
  0x42   : > { %3696 = vmatprep.subr.msk.mxu1 %vm529_vm1, %v457_v52  ;;  %3734 = vmatmul.mubr.msk.f32.vlgmr.msra.gmra.mxu0 %vm522_vm0, %v499_v53  ;;  %v2266_v23 = vld [vmem:[%s4633_s3 + $0x10] sm:$0xff]  ;;  %v3145_v26 = vld [vmem:[%s4636_s6 + $0x18] sm:$0xff]  ;;  %v3284_v28 = vld [vmem:[%s4638_s8] sm:$0xff]  ;;  %p3926_p13 = scmp.ne.s32.totalorder %s3380_s27, %s3925_s21  ;;  %p3933_p3 = scmp.lt.s32.totalorder %s3931_s23, %s3925_s21 }
  0x43   : > { %3741 = vmatprep.subr.msk.mxu0 %vm529_vm1, %v466_v54  ;;  %3743 = vmatprep.mubr.msk.f32.mxu0 %vm522_vm0, %v502_v55 }
  0x44   : > { %3689 = vmatmul.mubr.msk.f32.vlgmr.msra.gmra.mxu1 %vm522_vm0, %v481_v56  ;;  %3742 = vmatpush3.msk.msra.mxu0 %vm529_vm1, %v466_v54  ;;  %v2265_v54 = vld [vmem:[%s4633_s3 + $0x8] sm:$0xff]  ;;  %p3927_p0 = pnand %p3926_p13, %p4079_p6  ;;  %p3934_p4 = por %p3933_p3, %p3932_p2 }
  0x45   : > { %3697 = vmatpush3.msk.msra.mxu1 %vm529_vm1, %v457_v52  ;;  %3698 = vmatprep.mubr.msk.f32.mxu1 %vm522_vm0, %v484_v57  ;;  %v2268_v57 = vld [vmem:[%s4633_s3 + $0x20] sm:$0xff] }
  0x46   : > { %3706 = vmatprep.subr.msk.mxu1 %vm529_vm1, %v459_v58  ;;  %3744 = vmatmul.mubr.msk.f32.vlgmr.msra.gmra.mxu0 %vm522_vm0, %v503_v59  ;;  %p3928_p1 = pneg %p3927_p0 }
  0x47   : > { %3751 = vmatprep.subr.msk.mxu0 %vm529_vm1, %v468_v60  ;;  %3753 = vmatprep.mubr.msk.f32.mxu0 %vm522_vm0, %v506_v61 }
  0x48   : > { %3699 = vmatmul.mubr.msk.f32.vlgmr.msra.gmra.mxu1 %vm522_vm0, %v485_v62  ;;  %3752 = vmatpush3.msk.msra.mxu0 %vm529_vm1, %v468_v60  ;;  %p3935_p5 = pnand %p3934_p4, %p3928_p1 }
  0x49   : > { %3707 = vmatpush3.msk.msra.mxu1 %vm529_vm1, %v459_v58  ;;  %3708 = vmatprep.mubr.msk.f32.mxu1 %vm522_vm0, %v488_v63 }
  0x4a   : > { %3716 = vmatprep.subr.msk.mxu1 %vm529_vm1, %v461_v0  ;;  %3754 = vmatmul.mubr.msk.f32.vlgmr.msra.gmra.mxu0 %vm522_vm0, %v507_v1 }
  0x4b   : > { %519 = vperm.xlu0 %3923, %v511_v2   ;;  %3765 = vmatprep.mubr.msk.f32.mxu0 %vm2296_vm2, %v2264_v22 }
  0x4c   : > { %3709 = vmatmul.mubr.msk.f32.vlgmr.msra.gmra.mxu1 %vm522_vm0, %v489_v3  ;;  %2293 = vperm.xlu1 %3924, %v2285_v24  }
  0x4d   : > { %3717 = vmatpush3.msk.msra.mxu1 %vm529_vm1, %v461_v0  ;;  %3718 = vmatprep.mubr.msk.f32.mxu1 %vm522_vm0, %v492_v4 }
  0x4e   : > { %3726 = vmatprep.subr.msk.mxu1 %vm529_vm1, %v463_v5 }
  0x4f   : > { %514 = vperm.xlu0 %3923, %v510_v6  }
  0x50   : > { %3719 = vmatmul.mubr.msk.f32.vlgmr.msra.gmra.mxu1 %vm522_vm0, %v493_v7  ;;  %2288 = vperm.xlu1 %3924, %v2284_v25  }
  0x51   : > { %3727 = vmatpush3.msk.msra.mxu1 %vm529_vm1, %v463_v5  ;;  %3728 = vmatprep.mubr.msk.f32.mxu1 %vm522_vm0, %v496_v8 }
  0x52   : > { %3736 = vmatprep.subr.msk.mxu1 %vm529_vm1, %v465_v9 }
  0x53   : > { %3169 = vperm.xlu0 %3923, %v3146_v10  }
  0x54   : > { %3729 = vmatmul.mubr.msk.f32.vlgmr.msra.gmra.mxu1 %vm522_vm0, %v497_v11  ;;  %3164 = vperm.xlu1 %3924, %v3145_v26  }
  0x55   : > { %3737 = vmatpush3.msk.msra.mxu1 %vm529_vm1, %v465_v9  ;;  %3738 = vmatprep.mubr.msk.f32.mxu1 %vm522_vm0, %v500_v12  ;;  %v2267_v9 = vld [vmem:[%s4633_s3 + $0x18] sm:$0xff]  ;;  %v2270_v12 = vld [vmem:[%s4633_s3 + $0x30] sm:$0xff] }
  0x56   : > { %3746 = vmatprep.subr.msk.mxu1 %vm529_vm1, %v467_v13 }
  0x57   : > { %3159 = vperm.xlu0 %3923, %v3144_v14  }
  0x58   : > { %3739 = vmatmul.mubr.msk.f32.vlgmr.msra.gmra.mxu1 %vm522_vm0, %v501_v15  ;;  %3154 = vperm.xlu1 %3924, %v3143_v27  }
  0x59   : > { %3747 = vmatpush3.msk.msra.mxu1 %vm529_vm1, %v467_v13  ;;  %3748 = vmatprep.mubr.msk.f32.mxu1 %vm522_vm0, %v504_v16 }
  0x5a   : > { %3756 = vmatprep.subr.msk.mxu1 %vm529_vm1, %v469_v17 }
  0x5b   : > { %3149 = vperm.xlu0 %3923, %v3142_v18  }
  0x5c   : > { %3749 = vmatmul.mubr.msk.f32.vlgmr.msra.gmra.mxu1 %vm522_vm0, %v505_v19  ;;  %3287 = vperm.xlu1 %3924, %v3284_v28  }
  0x5d   : > { %3757 = vmatpush3.msk.msra.mxu1 %vm529_vm1, %v469_v17  ;;  %3758 = vmatprep.mubr.msk.f32.mxu1 %vm522_vm0, %v508_v20 }
  0x60   : > { %3759 = vmatmul.mubr.msk.f32.vlgmr.msra.gmra.mxu1 %vm522_vm0, %v509_v21 }
  0x61   : > { %3772 = vmatprep.mubr.msk.f32.mxu1 %vm2296_vm2, %v2266_v23 }
  0xc6   : > { %v4405_v29 = vpop.permute.xlu0 %519 }
  0xca   : > { %v4407_v31 = vpop.permute.xlu0 %514 }
  0xf0   : > { %v3665_v30 = vpop.f32.mrf.mxu1 }
  0xf1   : > { %v605_v34 = vadd.f32 %v3665_v30, %v4405_v29 }
  0xf2   : > { %v599_v32 = vpop.f32.mrf.mxu1  ;;  %v3695_v33 = vpop.f32.mrf.mxu0 }
  0xf3   : > { %v600_v37 = vadd.f32 %v599_v32, %v4407_v31  ;;  %v2205_v41 = vmax.f32 %v605_v34, 0.0  ;;  %v1109_v7 = vadd.f32 %v3695_v33, %v4405_v29 }
  0xf4   : > { %v3670_v35 = vpop.f32.mrf.mxu1  ;;  %v1103_v36 = vpop.f32.mrf.mxu0 }
  0xf5   : > { %v689_v38 = vadd.f32 %v3670_v35, %v4405_v29  ;;  %v2204_v46 = vmax.f32 %v600_v37, 0.0  ;;  %v2217_v18 = vmax.f32 %v1109_v7, 0.0  ;;  %v1104_v19 = vadd.f32 %v1103_v36, %v4407_v31  ;;  %v2269_v36 = vld [vmem:[%s4633_s3 + $0x28] sm:$0xff] }
  0xf6   : > { %v683_v39 = vpop.f32.mrf.mxu1  ;;  %v3705_v40 = vpop.f32.mrf.mxu0 }
  0xf7   : > { %v2207_v42 = vmax.f32 %v689_v38, 0.0  ;;  %v684_v43 = vadd.f32 %v683_v39, %v4407_v31  ;;  %v1277_v20 = vadd.f32 %v3705_v40, %v4405_v29  ;;  %v2216_v33 = vmax.f32 %v1104_v19, 0.0 }
  0xf8   : > { %v3675_v44 = vpop.f32.mrf.mxu1  ;;  %v4413_v45 = vpop.f32.mrf.mxu0 }
  0xf9   : > { %v2245_v47 = vmax.f32 %v2205_v41, %v2207_v42  ;;  %v2206_v48 = vmax.f32 %v684_v43, 0.0  ;;  %v773_v52 = vadd.f32 %v3675_v44, %v4405_v29  ;;  %v1272_v34 = vadd.f32 %v4413_v45, %v4407_v31  ;;  %v2272_v41 = vld [vmem:[%s4633_s3 + $0x40] sm:$0xff] }
  0xfa   : > { %v767_v49 = vpop.f32.mrf.mxu1  ;;  %v4415_v50 = vpop.f32.mrf.mxu0  ;;  %v2221_v37 = vmax.f32 %v1277_v20, 0.0 }
  0xfb   : > { %v2244_v51 = vmax.f32 %v2204_v46, %v2206_v48  ;;  %3761 = vmatprep.subr.mxu0 %v2245_v47  ;;  %v768_v55 = vadd.f32 %v767_v49, %v4407_v31  ;;  %v2209_v60 = vmax.f32 %v773_v52, 0.0  ;;  %v1445_v44 = vadd.f32 %v4415_v50, %v4405_v29 }
  0xfc   : > { %v3680_v53 = vpop.f32.mrf.mxu1  ;;  %3762 = vmatpush3.msra.mxu0 %v2245_v47  ;;  %v4426_v59 = vpop.f32.mrf.mxu0  ;;  %v2220_v48 = vmax.f32 %v1272_v34, 0.0 }
  0xfd   : > { %v857_v56 = vadd.f32 %v3680_v53, %v4405_v29  ;;  %3763 = vmatprep.subr.mxu0 %v2244_v51  ;;  %v2208_v0 = vmax.f32 %v768_v55, 0.0  ;;  %v1440_v52 = vadd.f32 %v4426_v59, %v4407_v31  ;;  %v2274_v55 = vld [vmem:[%s4633_s3 + $0x50] sm:$0xff] }
  0xfe   : > { %v851_v58 = vpop.f32.mrf.mxu1  ;;  %3764 = vmatpush3.msra.mxu0 %v2244_v51  ;;  %v4431_v3 = vpop.f32.mrf.mxu0  ;;  %v2271_v51 = vld [vmem:[%s4633_s3 + $0x38] sm:$0xff] }
  0xff   : > { %v2211_v61 = vmax.f32 %v857_v56, 0.0  ;;  %v852_v62 = vadd.f32 %v851_v58, %v4407_v31  ;;  %3766 = vmatmul.mubr.msk.f32.vlgmr.msra.gmra.mxu0 %vm2296_vm2, %v2265_v54  ;;  %v1613_v56 = vadd.f32 %v4431_v3, %v4405_v29 }
 0x100   : > { %v3685_v63 = vpop.f32.mrf.mxu1  ;;  %3779 = vmatprep.mubr.msk.f32.mxu0 %vm2296_vm2, %v2268_v57  ;;  %v4443_v13 = vpop.f32.mrf.mxu0 }
 0x101   : > { %v2247_v1 = vmax.f32 %v2209_v60, %v2211_v61  ;;  %v2210_v2 = vmax.f32 %v852_v62, 0.0  ;;  %v941_v6 = vadd.f32 %v3685_v63, %v4405_v29  ;;  %v2225_v60 = vmax.f32 %v1445_v44, 0.0 }
 0x102   : > { %v935_v4 = vpop.f32.mrf.mxu1  ;;  %v3735_v26 = vpop.f32.mrf.mxu0  ;;  %v1608_v63 = vadd.f32 %v4443_v13, %v4407_v31  ;;  %v2229_v7 = vmax.f32 %v1613_v56, 0.0 }
 0x103   : > { %v2246_v5 = vmax.f32 %v2208_v0, %v2210_v2  ;;  %3768 = vmatprep.subr.mxu1 %v2247_v1  ;;  %v936_v10 = vadd.f32 %v935_v4, %v4407_v31  ;;  %v2213_v15 = vmax.f32 %v941_v6, 0.0  ;;  %v2224_v2 = vmax.f32 %v1440_v52, 0.0  ;;  %v2276_v6 = vld [vmem:[%s4633_s3 + $0x60] sm:$0xff] }
 0x104   : > { %v3690_v8 = vpop.f32.mrf.mxu1  ;;  %3769 = vmatpush3.msra.mxu1 %v2247_v1  ;;  %v1775_v42 = vpop.f32.mrf.mxu0  ;;  %v2273_v1 = vld [vmem:[%s4633_s3 + $0x48] sm:$0xff] }
 0x105   : > { %v1025_v11 = vadd.f32 %v3690_v8, %v4405_v29  ;;  %3770 = vmatprep.subr.mxu1 %v2246_v5  ;;  %v2212_v22 = vmax.f32 %v936_v10, 0.0  ;;  %v1781_v10 = vadd.f32 %v3735_v26, %v4405_v29 }
 0x106   : > { %v1019_v14 = vpop.f32.mrf.mxu1  ;;  %3771 = vmatpush3.msra.mxu1 %v2246_v5  ;;  %v3745_v57 = vpop.f32.mrf.mxu0 }
 0x107   : > { %v2215_v16 = vmax.f32 %v1025_v11, 0.0  ;;  %v1020_v17 = vadd.f32 %v1019_v14, %v4407_v31  ;;  %3773 = vmatmul.mubr.msk.f32.vlgmr.msra.gmra.mxu1 %vm2296_vm2, %v2267_v9  ;;  %v2228_v14 = vmax.f32 %v1608_v63, 0.0  ;;  %v3988_v63 = vmov 0.0  }
 0x108   : > { %v3700_v21 = vpop.f32.mrf.mxu1  ;;  %3786 = vmatprep.mubr.msk.f32.mxu1 %vm2296_vm2, %v2270_v12  ;;  %v1943_v8 = vpop.f32.mrf.mxu0 }
 0x109   : > { %v2249_v23 = vmax.f32 %v2213_v15, %v2215_v16  ;;  %v2214_v24 = vmax.f32 %v1020_v17, 0.0  ;;  %v1193_v25 = vadd.f32 %v3700_v21, %v4405_v29  ;;  %v2275_v16 = vld [vmem:[%s4633_s3 + $0x58] sm:$0xff]  ;;  %v1776_v17 = vadd.f32 %v1775_v42, %v4407_v31  ;;  %v2278_v21 = vld [vmem:[%s4633_s3 + $0x70] sm:$0xff] }
 0x10a   : > { %v1187_v27 = vpop.f32.mrf.mxu1 }
 0x10b   : > { %v2248_v28 = vmax.f32 %v2212_v22, %v2214_v24  ;;  %v2219_v30 = vmax.f32 %v1193_v25, 0.0  ;;  %v1188_v32 = vadd.f32 %v1187_v27, %v4407_v31  ;;  %3775 = vmatprep.subr.mxu0 %v2249_v23  ;;  %v1949_v22 = vadd.f32 %v3745_v57, %v4405_v29 }
 0x10c   : > { %v3710_v35 = vpop.f32.mrf.mxu1  ;;  %3776 = vmatpush3.msra.mxu0 %v2249_v23  ;;  %v3755_v23 = vpop.f32.mrf.mxu0  ;;  %v2233_v25 = vmax.f32 %v1781_v10, 0.0  ;;  %v2232_v34 = vmax.f32 %v1776_v17, 0.0 }
 0x10d   : > { %v2251_v38 = vmax.f32 %v2217_v18, %v2219_v30  ;;  %v2218_v39 = vmax.f32 %v1188_v32, 0.0  ;;  %v1361_v40 = vadd.f32 %v3710_v35, %v4405_v29  ;;  %3777 = vmatprep.subr.mxu0 %v2248_v28  ;;  %v1944_v30 = vadd.f32 %v1943_v8, %v4407_v31 }
 0x10e   : > { %v1355_v43 = vpop.f32.mrf.mxu1  ;;  %3778 = vmatpush3.msra.mxu0 %v2248_v28  ;;  %v2117_v42 = vadd.f32 %v3755_v23, %v4405_v29 }
 0x10f   : > { %v2250_v45 = vmax.f32 %v2216_v33, %v2218_v39  ;;  %v2223_v46 = vmax.f32 %v1361_v40, 0.0  ;;  %v1356_v47 = vadd.f32 %v1355_v43, %v4407_v31  ;;  %3782 = vmatprep.subr.mxu1 %v2251_v38  ;;  %3780 = vmatmul.mubr.msk.f32.vlgmr.msra.gmra.mxu0 %vm2296_vm2, %v2269_v36  ;;  %v2277_v33 = vld [vmem:[%s4633_s3 + $0x68] sm:$0xff]  ;;  %v2237_v39 = vmax.f32 %v1949_v22, 0.0  ;;  %v2111_v40 = vpop.f32.mrf.mxu0 }
 0x110   : > { %v3720_v49 = vpop.f32.mrf.mxu1  ;;  %3783 = vmatpush3.msra.mxu1 %v2251_v38  ;;  %3793 = vmatprep.mubr.msk.f32.mxu0 %vm2296_vm2, %v2272_v41  ;;  %v2280_v38 = vld [vmem:[%s4633_s3 + $0x80] sm:$0xff] }
 0x111   : > { %v2253_v50 = vmax.f32 %v2221_v37, %v2223_v46  ;;  %v2222_v53 = vmax.f32 %v1356_v47, 0.0  ;;  %v1529_v54 = vadd.f32 %v3720_v49, %v4405_v29  ;;  %3784 = vmatprep.subr.mxu1 %v2250_v45  ;;  %v2236_v46 = vmax.f32 %v1944_v30, 0.0 }
 0x112   : > { %v1523_v58 = vpop.f32.mrf.mxu1  ;;  %3785 = vmatpush3.msra.mxu1 %v2250_v45  ;;  %v2112_v49 = vadd.f32 %v2111_v40, %v4407_v31 }
 0x113   : > { %v2252_v61 = vmax.f32 %v2220_v48, %v2222_v53  ;;  %v2227_v62 = vmax.f32 %v1529_v54, 0.0  ;;  %v1524_v59 = vadd.f32 %v1523_v58, %v4407_v31  ;;  %3789 = vmatprep.subr.mxu0 %v2253_v50  ;;  %3787 = vmatmul.mubr.msk.f32.vlgmr.msra.gmra.mxu1 %vm2296_vm2, %v2271_v51  ;;  %v2279_v48 = vld [vmem:[%s4633_s3 + $0x78] sm:$0xff]  ;;  %v2282_v53 = vld [vmem:[%s4633_s3 + $0x90] sm:$0xff] }
 0x114   : > { %v3730_v0 = vpop.f32.mrf.mxu1  ;;  %3790 = vmatpush3.msra.mxu0 %v2253_v50  ;;  %3800 = vmatprep.mubr.msk.f32.mxu1 %vm2296_vm2, %v2274_v55  ;;  %v2241_v55 = vmax.f32 %v2117_v42, 0.0 }
 0x115   : > { %v2255_v3 = vmax.f32 %v2225_v60, %v2227_v62  ;;  %v2226_v4 = vmax.f32 %v1524_v59, 0.0  ;;  %v1697_v5 = vadd.f32 %v3730_v0, %v4405_v29  ;;  %3791 = vmatprep.subr.mxu0 %v2252_v61  ;;  %v2240_v60 = vmax.f32 %v2112_v49, 0.0 }
 0x116   : > { %v1691_v9 = vpop.f32.mrf.mxu1  ;;  %3792 = vmatpush3.msra.mxu0 %v2252_v61 }
 0x117   : > { %v2254_v11 = vmax.f32 %v2224_v2, %v2226_v4  ;;  %v2231_v12 = vmax.f32 %v1697_v5, 0.0  ;;  %v1692_v13 = vadd.f32 %v1691_v9, %v4407_v31  ;;  %3796 = vmatprep.subr.mxu1 %v2255_v3  ;;  %3794 = vmatmul.mubr.msk.f32.vlgmr.msra.gmra.mxu0 %vm2296_vm2, %v2273_v1 }
 0x118   : > { %v3740_v15 = vpop.f32.mrf.mxu1  ;;  %3797 = vmatpush3.msra.mxu1 %v2255_v3  ;;  %3807 = vmatprep.mubr.msk.f32.mxu0 %vm2296_vm2, %v2276_v6 }
 0x119   : > { %v2257_v18 = vmax.f32 %v2229_v7, %v2231_v12  ;;  %v2230_v19 = vmax.f32 %v1692_v13, 0.0  ;;  %v1865_v20 = vadd.f32 %v3740_v15, %v4405_v29  ;;  %3798 = vmatprep.subr.mxu1 %v2254_v11 }
 0x11a   : > { %v1859_v24 = vpop.f32.mrf.mxu1  ;;  %3799 = vmatpush3.msra.mxu1 %v2254_v11 }
 0x11b   : > { %v2256_v26 = vmax.f32 %v2228_v14, %v2230_v19  ;;  %v2235_v27 = vmax.f32 %v1865_v20, 0.0  ;;  %v1860_v28 = vadd.f32 %v1859_v24, %v4407_v31  ;;  %3803 = vmatprep.subr.mxu0 %v2257_v18  ;;  %3801 = vmatmul.mubr.msk.f32.vlgmr.msra.gmra.mxu1 %vm2296_vm2, %v2275_v16  ;;  %v2294_v14 = vpop.permute.xlu1 %2293 }
 0x11c   : > { %v3750_v32 = vpop.f32.mrf.mxu1  ;;  %3804 = vmatpush3.msra.mxu0 %v2257_v18  ;;  %3814 = vmatprep.mubr.msk.f32.mxu1 %vm2296_vm2, %v2278_v21 }
 0x11d   : > { %v2259_v35 = vmax.f32 %v2233_v25, %v2235_v27  ;;  %v2234_v36 = vmax.f32 %v1860_v28, 0.0  ;;  %v2033_v37 = vadd.f32 %v3750_v32, %v4405_v29  ;;  %3805 = vmatprep.subr.mxu0 %v2256_v26 }
 0x11e   : > { %v2027_v41 = vpop.f32.mrf.mxu1  ;;  %3806 = vmatpush3.msra.mxu0 %v2256_v26 }
 0x11f   : > { %v2258_v43 = vmax.f32 %v2232_v34, %v2234_v36  ;;  %v2239_v44 = vmax.f32 %v2033_v37, 0.0  ;;  %v2028_v45 = vadd.f32 %v2027_v41, %v4407_v31  ;;  %3810 = vmatprep.subr.mxu1 %v2259_v35  ;;  %3808 = vmatmul.mubr.msk.f32.vlgmr.msra.gmra.mxu0 %vm2296_vm2, %v2277_v33  ;;  %v2289_v20 = vpop.permute.xlu1 %2288 }
 0x120   : > { %v3760_v47 = vpop.f32.mrf.mxu1  ;;  %3811 = vmatpush3.msra.mxu1 %v2259_v35  ;;  %3821 = vmatprep.mubr.msk.f32.mxu0 %vm2296_vm2, %v2280_v38 }
 0x121   : > { %v2261_v51 = vmax.f32 %v2237_v39, %v2239_v44  ;;  %v2238_v52 = vmax.f32 %v2028_v45, 0.0  ;;  %v2201_v50 = vadd.f32 %v3760_v47, %v4405_v29  ;;  %3812 = vmatprep.subr.mxu1 %v2258_v43  ;;  %v2281_v29 = vld [vmem:[%s4633_s3 + $0x88] sm:$0xff] }
 0x122   : > { %v2195_v54 = vpop.f32.mrf.mxu1  ;;  %3813 = vmatpush3.msra.mxu1 %v2258_v43 }
 0x123   : > { %v2260_v56 = vmax.f32 %v2236_v46, %v2238_v52  ;;  %v2243_v57 = vmax.f32 %v2201_v50, 0.0  ;;  %v2196_v58 = vadd.f32 %v2195_v54, %v4407_v31  ;;  %3817 = vmatprep.subr.mxu0 %v2261_v51  ;;  %3815 = vmatmul.mubr.msk.f32.vlgmr.msra.gmra.mxu1 %vm2296_vm2, %v2279_v48  ;;  %v2283_v31 = vld [vmem:[%s4633_s3 + $0x98] sm:$0xff] }
 0x124   : > { %3818 = vmatpush3.msra.mxu0 %v2261_v51  ;;  %3828 = vmatprep.mubr.msk.f32.mxu1 %vm2296_vm2, %v2282_v53 }
 0x125   : > { %v2263_v61 = vmax.f32 %v2241_v55, %v2243_v57  ;;  %v2242_v62 = vmax.f32 %v2196_v58, 0.0  ;;  %3819 = vmatprep.subr.mxu0 %v2260_v56 }
 0x126   : > { %3820 = vmatpush3.msra.mxu0 %v2260_v56 }
 0x127   : > { %v2262_v59 = vmax.f32 %v2240_v60, %v2242_v62  ;;  %3824 = vmatprep.subr.mxu1 %v2263_v61  ;;  %3822 = vmatmul.mubr.msk.f32.vlgmr.msra.gmra.mxu0 %vm2296_vm2, %v2281_v29 }
 0x128   : > { %3825 = vmatpush3.msra.mxu1 %v2263_v61  ;;  %3831 = vmatprep.subr.mxu0 %v3988_v63 }
 0x129   : > { %3826 = vmatprep.subr.mxu1 %v2262_v59  ;;  %3851 = vmatprep.mubr.msk.f32.mxu0 %vm3989_vm3, %v3988_v63 }
 0x12a   : > { %3827 = vmatpush3.msra.mxu1 %v2262_v59 }
 0x12b   : > { %3829 = vmatmul.mubr.msk.f32.vlgmr.msra.gmra.mxu1 %vm2296_vm2, %v2283_v31  ;;  %3866 = vmatprep.subr.mxu1 %v3988_v63 }
 0x12c   : > { %3876 = vmatprep.mubr.msk.f32.mxu1 %vm3989_vm3, %v3988_v63 }
 0x1bf   : > { %v3767_v0 = vpop.f32.mrf.mxu0 }
 0x1c0   : > { %v2375_v56 = vadd.f32 %v3767_v0, %v2294_v14 }
 0x1c1   : > { %v4542_v1 = vpop.f32.mrf.mxu0 }
 0x1c2   : > { %v2370_v61 = vadd.f32 %v4542_v1, %v2289_v20  ;;  %v3108_v0 = vmax.f32 %v2375_v56, 0.0 }
 0x1c7   : > { %v3774_v2 = vpop.f32.mrf.mxu1 }
 0x1c8   : > { %v2456_v57 = vadd.f32 %v3774_v2, %v2294_v14  ;;  %v3107_v2 = vmax.f32 %v2370_v61, 0.0 }
 0x1c9   : > { %v4544_v4 = vpop.f32.mrf.mxu1 }
 0x1ca   : > { %v2451_v62 = vadd.f32 %v4544_v4, %v2289_v20 }
 0x1cf   : > { %v3781_v3 = vpop.f32.mrf.mxu0 }
 0x1d0   : > { %v2537_v46 = vadd.f32 %v3781_v3, %v2294_v14 }
 0x1d1   : > { %v2531_v5 = vpop.f32.mrf.mxu0 }
 0x1d2   : > { %v2532_v52 = vadd.f32 %v2531_v5, %v2289_v20  ;;  %v3112_v58 = vmax.f32 %v2537_v46, 0.0  ;;  %v3110_v5 = vmax.f32 %v2456_v57, 0.0 }
 0x1d3   : > { %v3788_v6 = vpop.f32.mrf.mxu1 }
 0x1d4   : > { %v2618_v47 = vadd.f32 %v3788_v6, %v2294_v14  ;;  %v3111_v59 = vmax.f32 %v2532_v52, 0.0  ;;  %v3128_v1 = vmax.f32 %v3108_v0, %v3110_v5 }
 0x1d5   : > { %v2612_v8 = vpop.f32.mrf.mxu1 }
 0x1d6   : > { %v2613_v50 = vadd.f32 %v2612_v8, %v2289_v20  ;;  %v3114_v29 = vmax.f32 %v2618_v47, 0.0 }
 0x1d7   : > { %v3795_v7 = vpop.f32.mrf.mxu0 }
 0x1d8   : > { %v2699_v34 = vadd.f32 %v3795_v7, %v2294_v14  ;;  %v3113_v31 = vmax.f32 %v2613_v50, 0.0  ;;  %v3130_v6 = vmax.f32 %v3112_v58, %v3114_v29  ;;  %v3109_v7 = vmax.f32 %v2451_v62, 0.0 }
 0x1d9   : > { %v2693_v9 = vpop.f32.mrf.mxu0 }
 0x1da   : > { %v2694_v41 = vadd.f32 %v2693_v9, %v2289_v20  ;;  %v3116_v48 = vmax.f32 %v2699_v34, 0.0  ;;  %v3129_v8 = vmax.f32 %v3111_v59, %v3113_v31  ;;  %v3127_v4 = vmax.f32 %v3107_v2, %v3109_v7  ;;  %v3137_v9 = vld [vmem:[%s4635_s5] sm:$0xff] }
 0x1db   : > { %v3802_v10 = vpop.f32.mrf.mxu1 }
 0x1dc   : > { %v2780_v35 = vadd.f32 %v3802_v10, %v2294_v14  ;;  %v3115_v53 = vmax.f32 %v2694_v41, 0.0  ;;  %v3138_v10 = vld [vmem:[%s4635_s5 + $0x8] sm:$0xff]  ;;  %v3283_v41 = vld [vmem:[%s4637_s7] sm:$0xff] }
 0x1dd   : > { %v2774_v12 = vpop.f32.mrf.mxu1 }
 0x1de   : > { %v2775_v42 = vadd.f32 %v2774_v12, %v2289_v20  ;;  %v3118_v49 = vmax.f32 %v2780_v35, 0.0  ;;  %v3140_v12 = vld [vmem:[%s4635_s5 + $0x18] sm:$0xff] }
 0x1df   : > { %v3809_v11 = vpop.f32.mrf.mxu0 }
 0x1e0   : > { %v2861_v21 = vadd.f32 %v3809_v11, %v2294_v14  ;;  %v3117_v54 = vmax.f32 %v2775_v42, 0.0  ;;  %v3132_v60 = vmax.f32 %v3116_v48, %v3118_v49  ;;  %v3139_v11 = vld [vmem:[%s4635_s5 + $0x10] sm:$0xff] }
 0x1e1   : > { %v2855_v13 = vpop.f32.mrf.mxu0 }
 0x1e2   : > { %v2856_v26 = vadd.f32 %v2855_v13, %v2289_v20  ;;  %v3120_v36 = vmax.f32 %v2861_v21, 0.0  ;;  %v3131_v3 = vmax.f32 %v3115_v53, %v3117_v54  ;;  %v3141_v13 = vld [vmem:[%s4635_s5 + $0x20] sm:$0xff] }
 0x1e3   : > { %v3816_v15 = vpop.f32.mrf.mxu1 }
 0x1e4   : > { %v2942_v23 = vadd.f32 %v3816_v15, %v2294_v14  ;;  %v3119_v43 = vmax.f32 %v2856_v26, 0.0 }
 0x1e5   : > { %v2936_v17 = vpop.f32.mrf.mxu1 }
 0x1e6   : > { %v2937_v28 = vadd.f32 %v2936_v17, %v2289_v20  ;;  %v3122_v37 = vmax.f32 %v2942_v23, 0.0 }
 0x1e7   : > { %v3823_v16 = vpop.f32.mrf.mxu0 }
 0x1e8   : > { %v3023_v19 = vadd.f32 %v3823_v16, %v2294_v14  ;;  %v3121_v44 = vmax.f32 %v2937_v28, 0.0  ;;  %v3134_v51 = vmax.f32 %v3120_v36, %v3122_v37 }
 0x1e9   : > { %v3017_v18 = vpop.f32.mrf.mxu0 }
 0x1ea   : > { %v3018_v24 = vadd.f32 %v3017_v18, %v2289_v20  ;;  %v3124_v30 = vmax.f32 %v3023_v19, 0.0  ;;  %v3133_v55 = vmax.f32 %v3119_v43, %v3121_v44  ;;  %v3170_v19 = vpop.permute.xlu0 %3169 }
 0x1eb   : > { %v3830_v22 = vpop.f32.mrf.mxu1 }
 0x1ec   : > { %v3104_v25 = vadd.f32 %v3830_v22, %v2294_v14  ;;  %v3123_v38 = vmax.f32 %v3018_v24, 0.0  ;;  %v3165_v22 = vpop.permute.xlu1 %3164 }
 0x1ed   : > { %v3098_v27 = vpop.f32.mrf.mxu1 }
 0x1ee   : > { %v3126_v32 = vmax.f32 %v3104_v25, 0.0  ;;  %v3099_v33 = vadd.f32 %v3098_v27, %v2289_v20  ;;  %v3160_v24 = vpop.permute.xlu0 %3159 }
 0x1f0   : > { %v3136_v39 = vmax.f32 %v3124_v30, %v3126_v32  ;;  %v3125_v40 = vmax.f32 %v3099_v33, 0.0  ;;  %v3155_v33 = vpop.permute.xlu1 %3154 }
 0x1f2   : > { %v3135_v45 = vmax.f32 %v3123_v38, %v3125_v40  ;;  %3832 = vmatpush3.msra.mxu0 %v3136_v39  ;;  %v3150_v36 = vpop.permute.xlu0 %3149 }
 0x1f3   : > { %3833 = vmatprep.subr.mxu0 %v3988_v63 }
 0x1f4   : > { %3834 = vmatpush3.msra.mxu0 %v3135_v45  ;;  %v3288_v42 = vpop.permute.xlu1 %3287 }
 0x1f5   : > { %3835 = vmatprep.subr.mxu0 %v3988_v63 }
 0x1f6   : > { %3836 = vmatpush3.msra.mxu0 %v3134_v51 }
 0x1f7   : > { %3837 = vmatprep.subr.mxu0 %v3988_v63 }
 0x1f8   : > { %3838 = vmatpush3.msra.mxu0 %v3133_v55 }
 0x1f9   : > { %3839 = vmatprep.subr.mxu0 %v3988_v63 }
 0x1fa   : > { %3840 = vmatpush3.msra.mxu0 %v3132_v60 }
 0x1fb   : > { %3841 = vmatprep.subr.mxu0 %v3988_v63 }
 0x1fc   : > { %3842 = vmatpush3.msra.mxu0 %v3131_v3 }
 0x1fd   : > { %3843 = vmatprep.subr.mxu0 %v3988_v63 }
 0x1fe   : > { %3844 = vmatpush3.msra.mxu0 %v3130_v6 }
 0x1ff   : > { %3845 = vmatprep.subr.mxu0 %v3988_v63 }
 0x200   : > { %3846 = vmatpush3.msra.mxu0 %v3129_v8 }
 0x201   : > { %3847 = vmatprep.subr.mxu0 %v3988_v63 }
 0x202   : > { %3848 = vmatpush3.msra.mxu0 %v3128_v1 }
 0x203   : > { %3849 = vmatprep.subr.mxu0 %v3988_v63 }
 0x204   : > { %3850 = vmatpush3.msra.mxu0 %v3127_v4 }
 0x205   : > { %3852 = vmatmul.mubr.msk.f32.vlgmr.msra.gmra.mxu0 %vm3172_vm4, %v3137_v9 }
 0x206   : > { %3854 = vmatprep.mubr.msk.f32.mxu0 %vm3989_vm3, %v3988_v63 }
 0x209   : > { %3855 = vmatmul.mubr.msk.f32.gmra.mxu0 %vm3172_vm4, %v3138_v10 }
 0x20a   : > { %3857 = vmatprep.mubr.msk.f32.mxu0 %vm3989_vm3, %v3988_v63 }
 0x20d   : > { %3858 = vmatmul.mubr.msk.f32.gmra.mxu0 %vm3172_vm4, %v3139_v11 }
 0x20e   : > { %3860 = vmatprep.mubr.msk.f32.mxu0 %vm3989_vm3, %v3988_v63 }
 0x211   : > { %3861 = vmatmul.mubr.msk.f32.gmra.mxu0 %vm3172_vm4, %v3140_v12 }
 0x212   : > { %3863 = vmatprep.mubr.msk.f32.mxu0 %vm3989_vm3, %v3988_v63 }
 0x215   : > { %3864 = vmatmul.mubr.msk.f32.gmra.mxu0 %vm3172_vm4, %v3141_v13 }
 0x2c5   : > { %v3254_v14 = vpop.f32.mrf.mxu0 }
 0x2c6   : > { %v3255_v37 = vadd.f32 %v3254_v14, %v3150_v36 }
 0x2c7   : > { %v3853_v15 = vpop.f32.mrf.mxu0 }
 0x2c8   : > { %v3278_v40 = vmax.f32 %v3255_v37, 0.0 }
 0x2c9   : > { %v3259_v16 = vpop.f32.mrf.mxu0 }
 0x2ca   : > { %v3260_v34 = vadd.f32 %v3259_v16, %v3155_v33 }
 0x2cb   : > { %v3856_v17 = vpop.f32.mrf.mxu0 }
 0x2cc   : > { %v3279_v39 = vmax.f32 %v3260_v34, 0.0 }
 0x2cd   : > { %v3264_v18 = vpop.f32.mrf.mxu0 }
 0x2ce   : > { %v3265_v30 = vadd.f32 %v3264_v18, %v3160_v24 }
 0x2cf   : > { %v3859_v20 = vpop.f32.mrf.mxu0 }
 0x2d0   : > { %v3280_v38 = vmax.f32 %v3265_v30, 0.0 }
 0x2d1   : > { %v3269_v21 = vpop.f32.mrf.mxu0 }
 0x2d2   : > { %v3270_v26 = vadd.f32 %v3269_v21, %v3165_v22 }
 0x2d3   : > { %v3862_v23 = vpop.f32.mrf.mxu0 }
 0x2d4   : > { %v3281_v35 = vmax.f32 %v3270_v26, 0.0 }
 0x2d5   : > { %v3274_v25 = vpop.f32.mrf.mxu0 }
 0x2d6   : > { %v3275_v27 = vadd.f32 %v3274_v25, %v3170_v19 }
 0x2d7   : > { %v3865_v28 = vpop.f32.mrf.mxu0 }
 0x2d8   : > { %v3282_v32 = vmax.f32 %v3275_v27, 0.0 }
 0x2da   : > { %3867 = vmatpush3.msra.mxu1 %v3282_v32 }
 0x2db   : > { %3868 = vmatprep.subr.mxu1 %v3988_v63 }
 0x2dc   : > { %3869 = vmatpush3.msra.mxu1 %v3281_v35 }
 0x2dd   : > { %3870 = vmatprep.subr.mxu1 %v3988_v63 }
 0x2de   : > { %3871 = vmatpush3.msra.mxu1 %v3280_v38 }
 0x2df   : > { %3872 = vmatprep.subr.mxu1 %v3988_v63 }
 0x2e0   : > { %3873 = vmatpush3.msra.mxu1 %v3279_v39 }
 0x2e1   : > { %3874 = vmatprep.subr.mxu1 %v3988_v63 }
 0x2e2   : > { %3875 = vmatpush3.msra.mxu1 %v3278_v40 }
 0x2e3   : > { %3877 = vmatmul.mubr.msk.f32.vlgmr.msra.gmra.mxu1 %vm3290_vm5, %v3283_v41 }
 0x3a3   : > { %v3360_v43 = vpop.f32.mrf.mxu1 }
 0x3a4   : > { %v3361_v44 = vadd.f32 %v3360_v43, %v3288_v42 }
 0x3a5   : > { %v3878_v45 = vpop.f32.mrf.mxu1 }
 0x3a6   : > { %3364 = vst [vmem:[%s449_s24] sm:$0xff] %v3361_v44 }
 0x3a7   : > { %3938 = shalt.err (!%p3935_p5)
}
 0x3a8   : > { %s3939_s25 = scalar_lea.hbm %s4593_s16, 128  ;;  %s3943_s24 = scalar_lea.hbm %s4639_s9, 256 }
 0x3a9   : > { %p3940_p7 = scmp.ne.s32.totalorder %s4593_s16, %s3939_s25  ;;  %p3944_p12 = scmp.lt.s32.totalorder %s4593_s16, %s4639_s9 }
 0x3aa   : > { %p3945_p13 = scmp.lt.s32.totalorder %s3943_s24, %s3939_s25 }
 0x3ab   : > { %p3941_p10 = pnand %p3940_p7, %p4079_p6 }
 0x3ac   : > { %p3946_p0 = por %p3945_p13, %p3944_p12 }
 0x3ad   : > { %p3942_p11 = pneg %p3941_p10 }
 0x3af   : > { %p3947_p1 = pnand %p3946_p0, %p3942_p11 }
 0x3b1   : > { %3950 = shalt.err (!%p3947_p1)
}
 0x3b2   : > { %3881 = dma.vmem_to_hbm [thread:$0]  (%p4079_p6), %s3380_s27, 128, %s4593_s16, %s3366_s17  }
 0x3b3 PF: > { %s3391_s21 = sand.u32 1, %s3973_s30   ;;  %p3884_p2 = pnand %p3446_p9, %p4083_p8 }
 0x3b4   : > { %s3392_s13 = scalar_lea.sflag [#allocation4], %s3391_s21 }
 0x3b5   : > { %p3885_p3 = pneg %p3884_p2 }
 0x3b7   : > { %3968 = dma.done.wait (%p3885_p3), %s3392_s13, 128  }
 0x3b8   : > { %3970 = vsyncadd (%p3885_p3), %s3392_s13, 4294967168  ;;  %p19_p4 = scmp.ge.s32.totalorder %s4064_s15, 4   ;;  %s4642_s30 = smov %s3977_s10 }
 0x3b9   : > { %s4643_s10 = smov %s3981_s11  ;;  %s4644_s11 = smov %s4077_s18 }
 0x3ba   : > { %s4645_s12 = smov %s4064_s15  ;;  %21 = sbr.rel (!%p19_p4) target bundleno = 3 (0x3), region = 137 }
 0x3bf   :  { %3397 = vsyncpa [#allocation4], 1 }
 0x3c0   :  { %3399 = vsyncpa [#allocation4 + $0x1], 1 }

</bundles_post_ra>
